<compile_context>
chip_gen: v6e
topology: v6e:2x2x1
jax: 0.10.0
libtpu: 0.0.40
codegen_flags: <defaults>
</compile_context>

<pallas_src>
import jax
import jax.numpy as jnp
from jax.experimental import pallas as pl
from jax.experimental.pallas import tpu as pltpu


def _mlp_kernel(x_ref, w0_ref, b0_ref, w1_ref, b1_ref, o_ref):
    cd = w0_ref.dtype
    # Layer 0: cast the x tile to the MXU dtype in-kernel (VPU op, hidden under
    # DMA/MXU), f32 accumulation, f32 bias+ReLU epilogue (safe on v5e: no bf16 VPU).
    h = jnp.dot(x_ref[...].astype(cd), w0_ref[...],
                preferred_element_type=jnp.float32)
    h = jnp.maximum(h + b0_ref[...], 0.0)          # b0 is [1, dim_0], broadcasts over rows
    # nn.Dropout(p=dropout_0): identity in eval mode.
    # Layer 1: second MXU pass on the bf16-cast activation, f32 accumulate.
    y = jnp.dot(h.astype(cd), w1_ref[...], preferred_element_type=jnp.float32)
    y = jnp.maximum(y + b1_ref[...], 0.0)          # b1 is [1, dim_1]
    # nn.Dropout(p=dropout_1): identity in eval mode.
    o_ref[...] = y.astype(o_ref.dtype)


def _round_up(x, m):
    return ((x + m - 1) // m) * m


def _pick_tm(batch, block_rows):
    """Row-tile size: multiple of 16 (bf16 sublane packing), capped at block_rows,
    and small enough that the grid has >= 2 steps so both v7x TensorCores get work."""
    tm = min(block_rows, _round_up(batch, 16))
    if batch > 16:
        tm = min(tm, _round_up(pl.cdiv(batch, 2), 16))
    return max(16, 16 * (tm // 16))


def prepare_mlp_params(w0, b0, w1, b1, compute_dtype=jnp.bfloat16):
    """One-time weight preparation (hoisted out of the per-call path): weights
    stored [fan_in, fan_out] in the MXU compute dtype, biases [1, fan_out] in f32.
    Call once at model-build time and reuse on every forward."""
    w0p = jnp.asarray(w0, compute_dtype)
    w1p = jnp.asarray(w1, compute_dtype)
    b0p = jnp.asarray(b0, jnp.float32).reshape(1, -1)
    b1p = jnp.asarray(b1, jnp.float32).reshape(1, -1)
    return w0p, b0p, w1p, b1p


def mlp_imp5_forward(x, w0p, b0p, w1p, b1p, *, block_rows=512, out_dtype=None):
    """Fused 2-layer MLP forward.

    x   : [B, in_features]        (cast to the compute dtype in-kernel)
    w0p : [in_features, dim_0]    (compute dtype, from prepare_mlp_params)
    b0p : [1, dim_0]              (f32)
    w1p : [dim_0, dim_1]          (compute dtype)
    b1p : [1, dim_1]              (f32)
    returns [B, dim_1] in out_dtype (default x.dtype; pass jnp.bfloat16 to halve
    the output write traffic if the consumer tolerates it).
    """
    batch, in_f = x.shape
    d0 = w0p.shape[1]
    d1 = w1p.shape[1]
    out_dtype = x.dtype if out_dtype is None else jnp.dtype(out_dtype)
    cd_bytes = jnp.dtype(w0p.dtype).itemsize

    tm = _pick_tm(batch, block_rows)
    grid = (pl.cdiv(batch, tm),)     # partial last block if tm does not divide B

    # Advisory cost hint so XLA schedules surrounding ops around the custom call.
    cost = pl.CostEstimate(
        flops=2 * batch * (in_f * d0 + d0 * d1),
        transcendentals=0,
        bytes_accessed=(batch * in_f * x.dtype.itemsize
                        + (in_f * d0 + d0 * d1) * cd_bytes
                        + (d0 + d1) * 4
                        + batch * d1 * out_dtype.itemsize),
    )

    def build(single_buffer_weights):
        if single_buffer_weights:
            # Constant-index residents: one buffer is enough; the default second
            # buffer only wastes VMEM (matters most on v7x's 64 MiB per TC).
            def resident(shape):
                return pl.BlockSpec(shape, lambda i: (0, 0),
                                    pipeline_mode=pl.Buffered(1))
        else:
            def resident(shape):
                return pl.BlockSpec(shape, lambda i: (0, 0))

        # VMEM budget from actual buffer sizes + physical capacity of this chip.
        n_wbuf = 1 if single_buffer_weights else 2
        resident_bytes = n_wbuf * ((in_f * d0 + d0 * d1) * cd_bytes + (d0 + d1) * 4)
        streamed_bytes = 2 * tm * (in_f * x.dtype.itemsize + d1 * out_dtype.itemsize)
        working_bytes = tm * (d0 + d1) * 4 + tm * d0 * cd_bytes
        needed = resident_bytes + streamed_bytes + working_bytes
        try:
            phys = pltpu.get_tpu_info().vmem_capacity_bytes
        except Exception:
            phys = 64 * 1024 * 1024                      # conservative: v7x per-TC VMEM
        vmem_limit = int(min(0.75 * phys, max(2 * needed, 32 * 1024 * 1024)))

        return pl.pallas_call(
            _mlp_kernel,
            out_shape=jax.ShapeDtypeStruct((batch, d1), out_dtype),
            grid=grid,
            in_specs=[
                pl.BlockSpec((tm, in_f), lambda i: (i, 0)),   # x: streamed per row tile
                resident((in_f, d0)),                         # W0: VMEM-resident
                resident((1, d0)),                            # b0
                resident((d0, d1)),                           # W1
                resident((1, d1)),                            # b1
            ],
            out_specs=pl.BlockSpec((tm, d1), lambda i: (i, 0)),
            compiler_params=pltpu.CompilerParams(
                dimension_semantics=("parallel",),            # shards batch tiles across TCs
                vmem_limit_bytes=vmem_limit,
            ),
            cost_estimate=cost,
        )

    try:
        return build(True)(x, w0p, b0p, w1p, b1p)
    except Exception:
        # Fallback for JAX/Mosaic builds that reject single-buffered resident
        # specs: still correct, just double-buffers the (small) weights.
        return build(False)(x, w0p, b0p, w1p, b1p)


def _torch_linear_init(key, fan_in, fan_out, dtype=jnp.float32):
    """Deterministic init mimicking torch.nn.Linear defaults:
    U(-1/sqrt(fan_in), 1/sqrt(fan_in)) for weight and bias; the weight is stored
    transposed ([fan_in, fan_out]) relative to torch's [out, in]."""
    kw, kb = jax.random.split(key)
    bound = 1.0 / (fan_in ** 0.5)
    w = jax.random.uniform(kw, (fan_in, fan_out), dtype, -bound, bound)
    b = jax.random.uniform(kb, (1, fan_out), dtype, -bound, bound)
    return w, b


if __name__ == "__main__":
    # Small shapes consistent with the module's forward:
    # MLP_IMP5(config, in_features=32, dim_0=64, dropout_0=0.1, dim_1=32, dropout_1=0.2)
    batch, in_features, dim_0, dim_1 = 64, 32, 64, 32
    dropout_0, dropout_1 = 0.1, 0.2   # identity in eval mode

    key = jax.random.PRNGKey(0)
    kx, k0, k1 = jax.random.split(key, 3)
    x = jax.random.normal(kx, (batch, in_features), jnp.float32)
    w0, b0 = _torch_linear_init(k0, in_features, dim_0)
    w1, b1 = _torch_linear_init(k1, dim_0, dim_1)

    # One-time weight prep (hoisted out of the per-call path).
    w0p, b0p, w1p, b1p = prepare_mlp_params(w0, b0, w1, b1)

    out = mlp_imp5_forward(x, w0p, b0p, w1p, b1p)
    out = jax.block_until_ready(out)
    assert out.shape == (batch, dim_1)
    assert out.dtype == x.dtype

    # Reference matched to the kernel's numerics (bf16 MXU operands, f32 accumulate).
    xb, w0b, w1b = (a.astype(jnp.bfloat16) for a in (x, w0, w1))
    h_ref = jnp.maximum(jnp.dot(xb, w0b, preferred_element_type=jnp.float32) + b0, 0.0)
    ref_bf16 = jnp.maximum(
        jnp.dot(h_ref.astype(jnp.bfloat16), w1b, preferred_element_type=jnp.float32) + b1,
        0.0)
    assert jnp.allclose(out, ref_bf16, atol=2e-3, rtol=2e-3)

    # Loose sanity check against the full-f32 reference (bf16 rounding tolerance).
    ref_f32 = jnp.maximum(jnp.maximum(x @ w0 + b0, 0.0) @ w1 + b1, 0.0)
    assert jnp.allclose(out, ref_f32, atol=5e-2, rtol=5e-2)

    print("KERNEL_OK")
</pallas_src>

<mosaic_0001>
module attributes {stable_mosaic.version = 11 : i64} {
  func.func @_mlp_kernel(%arg0: i32, %arg1: memref<32x32xf32, #tpu.memory_space<vmem>>, %arg2: memref<32x64xbf16, #tpu.memory_space<vmem>>, %arg3: memref<1x64xf32, #tpu.memory_space<vmem>>, %arg4: memref<64x32xbf16, #tpu.memory_space<vmem>>, %arg5: memref<1x32xf32, #tpu.memory_space<vmem>>, %arg6: memref<32x32xf32, #tpu.memory_space<vmem>>) attributes {dimension_semantics = [#tpu.dimension_semantics<parallel>], iteration_bounds = array<i64: 2>, scalar_prefetch = 0 : i64, scratch_operands = 0 : i64, tpu.core_type = #tpu.core_type<tc>, window_params = [{transform_indices = @transform_0, window_bounds = array<i64: 32, 32>}, {pipeline_mode = #tpu.pipeline_mode<synchronous>, transform_indices = @transform_1, window_bounds = array<i64: 32, 64>}, {pipeline_mode = #tpu.pipeline_mode<synchronous>, transform_indices = @transform_2, window_bounds = array<i64: 1, 64>}, {pipeline_mode = #tpu.pipeline_mode<synchronous>, transform_indices = @transform_3, window_bounds = array<i64: 64, 32>}, {pipeline_mode = #tpu.pipeline_mode<synchronous>, transform_indices = @transform_4, window_bounds = array<i64: 1, 32>}, {transform_indices = @transform_5, window_bounds = array<i64: 32, 32>}]} {
    %c0 = arith.constant 0 : index
    %c0_0 = arith.constant 0 : index
    %0 = vector.load %arg1[%c0, %c0_0] : memref<32x32xf32, #tpu.memory_space<vmem>>, vector<32x32xf32>
    %1 = arith.truncf %0 : vector<32x32xf32> to vector<32x32xbf16>
    %c0_1 = arith.constant 0 : index
    %c0_2 = arith.constant 0 : index
    %2 = vector.load %arg2[%c0_1, %c0_2] : memref<32x64xbf16, #tpu.memory_space<vmem>>, vector<32x64xbf16>
    %cst = arith.constant dense<0.000000e+00> : vector<32x64xf32>
    %3 = tpu.matmul %1, %2, %cst {dimension_numbers = #tpu.dot_dimension_numbers<[1], [0], [0], [1], [0, 0, 1, 1], [], []>} : vector<32x32xbf16>, vector<32x64xbf16>, vector<32x64xf32> -> vector<32x64xf32>
    %c0_3 = arith.constant 0 : index
    %c0_4 = arith.constant 0 : index
    %4 = vector.load %arg3[%c0_3, %c0_4] : memref<1x64xf32, #tpu.memory_space<vmem>>, vector<1x64xf32>
    %5 = vector.broadcast %4 : vector<1x64xf32> to vector<32x64xf32>
    %6 = arith.addf %3, %5 : vector<32x64xf32>
    %cst_5 = arith.constant 0.000000e+00 : f32
    %7 = vector.broadcast %cst_5 : f32 to vector<32x64xf32>
    %8 = arith.maximumf %6, %7 : vector<32x64xf32>
    %9 = arith.truncf %8 : vector<32x64xf32> to vector<32x64xbf16>
    %c0_6 = arith.constant 0 : index
    %c0_7 = arith.constant 0 : index
    %10 = vector.load %arg4[%c0_6, %c0_7] : memref<64x32xbf16, #tpu.memory_space<vmem>>, vector<64x32xbf16>
    %cst_8 = arith.constant dense<0.000000e+00> : vector<32x32xf32>
    %11 = tpu.matmul %9, %10, %cst_8 {dimension_numbers = #tpu.dot_dimension_numbers<[1], [0], [0], [1], [0, 0, 1, 1], [], []>} : vector<32x64xbf16>, vector<64x32xbf16>, vector<32x32xf32> -> vector<32x32xf32>
    %c0_9 = arith.constant 0 : index
    %c0_10 = arith.constant 0 : index
    %12 = vector.load %arg5[%c0_9, %c0_10] : memref<1x32xf32, #tpu.memory_space<vmem>>, vector<1x32xf32>
    %13 = vector.broadcast %12 : vector<1x32xf32> to vector<32x32xf32>
    %14 = arith.addf %11, %13 : vector<32x32xf32>
    %cst_11 = arith.constant 0.000000e+00 : f32
    %15 = vector.broadcast %cst_11 : f32 to vector<32x32xf32>
    %16 = arith.maximumf %14, %15 : vector<32x32xf32>
    %c0_12 = arith.constant 0 : index
    %c0_13 = arith.constant 0 : index
    %17 = vector.load %arg6[%c0_12, %c0_13] : memref<32x32xf32, #tpu.memory_space<vmem>>, vector<32x32xf32>
    tpu.vector_store %arg6[%c0_12, %c0_13], %16 {strides = array<i32>} : memref<32x32xf32, #tpu.memory_space<vmem>>, vector<32x32xf32>,
    return
  }
  func.func @transform_0(%arg0: i32) -> (i32, i32) {
    %c0_i32 = arith.constant 0 : i32
    %c0_i32_0 = arith.constant 0 : i32
    return %arg0, %c0_i32 : i32, i32
  }
  func.func @transform_1(%arg0: i32) -> (i32, i32) {
    %c0_i32 = arith.constant 0 : i32
    %c0_i32_0 = arith.constant 0 : i32
    %c0_i32_1 = arith.constant 0 : i32
    return %c0_i32, %c0_i32_0 : i32, i32
  }
  func.func @transform_2(%arg0: i32) -> (i32, i32) {
    %c0_i32 = arith.constant 0 : i32
    %c0_i32_0 = arith.constant 0 : i32
    %c0_i32_1 = arith.constant 0 : i32
    return %c0_i32, %c0_i32_0 : i32, i32
  }
  func.func @transform_3(%arg0: i32) -> (i32, i32) {
    %c0_i32 = arith.constant 0 : i32
    %c0_i32_0 = arith.constant 0 : i32
    %c0_i32_1 = arith.constant 0 : i32
    return %c0_i32, %c0_i32_0 : i32, i32
  }
  func.func @transform_4(%arg0: i32) -> (i32, i32) {
    %c0_i32 = arith.constant 0 : i32
    %c0_i32_0 = arith.constant 0 : i32
    %c0_i32_1 = arith.constant 0 : i32
    return %c0_i32, %c0_i32_0 : i32, i32
  }
  func.func @transform_5(%arg0: i32) -> (i32, i32) {
    %c0_i32 = arith.constant 0 : i32
    %c0_i32_0 = arith.constant 0 : i32
    return %arg0, %c0_i32 : i32, i32
  }
}

module attributes {stable_mosaic.version = 11 : i64} {
  func.func @_mlp_kernel(%arg0: i32, %arg1: memref<32x32xf32, #tpu.memory_space<vmem>>, %arg2: memref<32x64xbf16, #tpu.memory_space<vmem>>, %arg3: memref<1x64xf32, #tpu.memory_space<vmem>>, %arg4: memref<64x32xbf16, #tpu.memory_space<vmem>>, %arg5: memref<1x32xf32, #tpu.memory_space<vmem>>, %arg6: memref<32x32xf32, #tpu.memory_space<vmem>>) attributes {dimension_semantics = [#tpu.dimension_semantics<parallel>], iteration_bounds = array<i64: 2>, scalar_prefetch = 0 : i64, scratch_operands = 0 : i64, tpu.core_type = #tpu.core_type<tc>, window_params = [{transform_indices = @transform_0, window_bounds = array<i64: 32, 32>}, {pipeline_mode = #tpu.pipeline_mode<synchronous>, transform_indices = @transform_1, window_bounds = array<i64: 32, 64>}, {pipeline_mode = #tpu.pipeline_mode<synchronous>, transform_indices = @transform_2, window_bounds = array<i64: 1, 64>}, {pipeline_mode = #tpu.pipeline_mode<synchronous>, transform_indices = @transform_3, window_bounds = array<i64: 64, 32>}, {pipeline_mode = #tpu.pipeline_mode<synchronous>, transform_indices = @transform_4, window_bounds = array<i64: 1, 32>}, {transform_indices = @transform_5, window_bounds = array<i64: 32, 32>}]} {
    %c0 = arith.constant 0 : index
    %c0_0 = arith.constant 0 : index
    %0 = vector.load %arg1[%c0, %c0_0] : memref<32x32xf32, #tpu.memory_space<vmem>>, vector<32x32xf32>
    %1 = arith.truncf %0 : vector<32x32xf32> to vector<32x32xbf16>
    %c0_1 = arith.constant 0 : index
    %c0_2 = arith.constant 0 : index
    %2 = vector.load %arg2[%c0_1, %c0_2] : memref<32x64xbf16, #tpu.memory_space<vmem>>, vector<32x64xbf16>
    %cst = arith.constant dense<0.000000e+00> : vector<32x64xf32>
    %3 = tpu.matmul %1, %2, %cst {dimension_numbers = #tpu.dot_dimension_numbers<[1], [0], [0], [1], [0, 0, 1, 1], [], []>} : vector<32x32xbf16>, vector<32x64xbf16>, vector<32x64xf32> -> vector<32x64xf32>
    %c0_3 = arith.constant 0 : index
    %c0_4 = arith.constant 0 : index
    %4 = vector.load %arg3[%c0_3, %c0_4] : memref<1x64xf32, #tpu.memory_space<vmem>>, vector<1x64xf32>
    %5 = vector.broadcast %4 : vector<1x64xf32> to vector<32x64xf32>
    %6 = arith.addf %3, %5 : vector<32x64xf32>
    %cst_5 = arith.constant 0.000000e+00 : f32
    %7 = vector.broadcast %cst_5 : f32 to vector<32x64xf32>
    %8 = arith.maximumf %6, %7 : vector<32x64xf32>
    %9 = arith.truncf %8 : vector<32x64xf32> to vector<32x64xbf16>
    %c0_6 = arith.constant 0 : index
    %c0_7 = arith.constant 0 : index
    %10 = vector.load %arg4[%c0_6, %c0_7] : memref<64x32xbf16, #tpu.memory_space<vmem>>, vector<64x32xbf16>
    %cst_8 = arith.constant dense<0.000000e+00> : vector<32x32xf32>
    %11 = tpu.matmul %9, %10, %cst_8 {dimension_numbers = #tpu.dot_dimension_numbers<[1], [0], [0], [1], [0, 0, 1, 1], [], []>} : vector<32x64xbf16>, vector<64x32xbf16>, vector<32x32xf32> -> vector<32x32xf32>
    %c0_9 = arith.constant 0 : index
    %c0_10 = arith.constant 0 : index
    %12 = vector.load %arg5[%c0_9, %c0_10] : memref<1x32xf32, #tpu.memory_space<vmem>>, vector<1x32xf32>
    %13 = vector.broadcast %12 : vector<1x32xf32> to vector<32x32xf32>
    %14 = arith.addf %11, %13 : vector<32x32xf32>
    %cst_11 = arith.constant 0.000000e+00 : f32
    %15 = vector.broadcast %cst_11 : f32 to vector<32x32xf32>
    %16 = arith.maximumf %14, %15 : vector<32x32xf32>
    %c0_12 = arith.constant 0 : index
    %c0_13 = arith.constant 0 : index
    %17 = vector.load %arg6[%c0_12, %c0_13] : memref<32x32xf32, #tpu.memory_space<vmem>>, vector<32x32xf32>
    tpu.vector_store %arg6[%c0_12, %c0_13], %16 {strides = array<i32>} : memref<32x32xf32, #tpu.memory_space<vmem>>, vector<32x32xf32>,
    return
  }
  func.func @transform_0(%arg0: i32) -> (i32, i32) {
    %c0_i32 = arith.constant 0 : i32
    %c0_i32_0 = arith.constant 0 : i32
    return %arg0, %c0_i32 : i32, i32
  }
  func.func @transform_1(%arg0: i32) -> (i32, i32) {
    %c0_i32 = arith.constant 0 : i32
    %c0_i32_0 = arith.constant 0 : i32
    %c0_i32_1 = arith.constant 0 : i32
    return %c0_i32, %c0_i32_0 : i32, i32
  }
  func.func @transform_2(%arg0: i32) -> (i32, i32) {
    %c0_i32 = arith.constant 0 : i32
    %c0_i32_0 = arith.constant 0 : i32
    %c0_i32_1 = arith.constant 0 : i32
    return %c0_i32, %c0_i32_0 : i32, i32
  }
  func.func @transform_3(%arg0: i32) -> (i32, i32) {
    %c0_i32 = arith.constant 0 : i32
    %c0_i32_0 = arith.constant 0 : i32
    %c0_i32_1 = arith.constant 0 : i32
    return %c0_i32, %c0_i32_0 : i32, i32
  }
  func.func @transform_4(%arg0: i32) -> (i32, i32) {
    %c0_i32 = arith.constant 0 : i32
    %c0_i32_0 = arith.constant 0 : i32
    %c0_i32_1 = arith.constant 0 : i32
    return %c0_i32, %c0_i32_0 : i32, i32
  }
  func.func @transform_5(%arg0: i32) -> (i32, i32) {
    %c0_i32 = arith.constant 0 : i32
    %c0_i32_0 = arith.constant 0 : i32
    return %arg0, %c0_i32 : i32, i32
  }
}

</mosaic_0001>

<bundles_post_ra>
// kernel: tpu_custom_call.1
= control target key start
LH: loop header
LB: loop body
LE: loop exit
PB: predicated region body
PF: predicated region fallthrough
CT: control target
= control target key end

     0   :  { %s584_s18 = smov 0   ;;  %s638_s0 = inlined_call_operand.vmem [shape: f32[64,32], index: 0, kind: input, shape index: {}]   ;;  %s639_s1 = inlined_call_operand.vmem [shape: bf16[32,64], index: 1, kind: input, shape index: {}]   ;;  %s640_s2 = inlined_call_operand.vmem [shape: f32[1,64], index: 2, kind: input, shape index: {}]   ;;  %s641_s3 = inlined_call_operand.vmem [shape: bf16[64,32], index: 3, kind: input, shape index: {}]   ;;  %s642_s4 = inlined_call_operand.vmem [shape: f32[1,32], index: 4, kind: input, shape index: {}]   ;;  %s643_s5 = inlined_call_operand.vmem [shape: f32[64,32], index: 5, kind: output, shape index: {}]  }
   0x1 LB: > { %s479_s19 = sadd.s32 4294967295, %s552_s18   ;;  %p483_p0 = scmp.ge.s32.totalorder %s552_s18, 1  ;;  %s552_s18 = sphi %s584_s18, %s15_s18  }
   0x2   : > { %p188_p1 = scmp.lt.s32.totalorder %s552_s18, 3 }
   0x4   : > { %p189_p2 = pnand %p483_p0, %p188_p1 }
   0x5   : > { %s484_s22 = sshll.u32 (!%p189_p2), %s479_s19, 2 }
   0x6   : > { %192 = sbr.rel (%p189_p2) target bundleno = 430 (0x1ae), region = 40  ;;  %p217_p3 = scmp.lt.s32.totalorder (!%p189_p2), %s484_s22, 7 }
   0xb   : > { %v540_v0 = vld [vmem:[%s639_s1 + $0x8] sm:$0xff]   ;;  %v541_v1 = vld [vmem:[%s639_s1] sm:$0xff]   ;;  %v542_v2 = vld [vmem:[%s641_s3 + $0x18] sm:$0xff]   ;;  %s645_s22 = smov (!%p217_p3, %s484_s22), 7  ;;  %vm258_vm0 = vcmask 261120   ;;  %vm359_vm1 = vcmask 523264  }
   0xc   : > { %512 = vmatprep.subr.bf16.mxu0 %v540_v0  ;;  %520 = vmatprep.subr.bf16.mxu1 %v542_v2  ;;  %s485_s27 = sshll.u32 %s645_s22, 3  ;;  %v543_v9 = vld [vmem:[%s641_s3 + $0x10] sm:$0xff]   ;;  %v544_v10 = vld [vmem:[%s641_s3 + $0x8] sm:$0xff]   ;;  %v545_v11 = vld [vmem:[%s641_s3] sm:$0xff]  }
   0xd   : > { %513 = vmatpush3.bf16.msra.mxu0 %v540_v0  ;;  %521 = vmatpush3.bf16.msra.mxu1 %v542_v2  ;;  %s220_s30 = scalar_lea.vmem %s638_s0, %s485_s27  ;;  %v488_v14 = vld [vmem:[%s640_s2] ss:$0 sm:$0xff]  ;;  %s226_s19 = scalar_lea.vmem %s643_s5, %s485_s27 }
   0xe   : > { %514 = vmatprep.subr.bf16.mxu0 %v541_v1  ;;  %v229_v3 = vld [vmem:[%s220_s30] sm:$0xff]  ;;  %v230_v4 = vld [vmem:[%s220_s30 + $0x8] sm:$0xff]  ;;  %v231_v5 = vld [vmem:[%s220_s30 + $0x10] sm:$0xff]  ;;  %522 = vmatprep.subr.bf16.mxu1 %v543_v9 }
   0xf   : > { %v233_v6 = vpack.c.bf16 %v230_v4, %v229_v3  ;;  %v232_v7 = vld [vmem:[%s220_s30 + $0x18] sm:$0xff]  ;;  %v493_v28 = vld [vmem:[%s642_s4] ss:$0 sm:$0xff] }
  0x10   : > { %v234_v8 = vpack.c.bf16 %v232_v7, %v231_v5 }
  0x11   : > { %515 = vmatpush3.bf16.msra.mxu0 %v541_v1  ;;  %516 = vmatprep.mubr.msk.bf16.mxu0 %vm258_vm0, %v233_v6 }
  0x12   : > { %523 = vmatpush3.bf16.msra.mxu1 %v543_v9 }
  0x13   : > { %524 = vmatprep.subr.bf16.mxu1 %v544_v10 }
  0x14   : > { %517 = vmatmul.mubr.msk.bf16.vlgmr.msra.gmra.mxu0 %vm258_vm0, %v234_v8 }
  0x16   : > { %525 = vmatpush3.bf16.msra.mxu1 %v544_v10 }
  0x17   : > { %526 = vmatprep.subr.bf16.mxu1 %v545_v11 }
  0x1a   : > { %527 = vmatpush3.bf16.msra.mxu1 %v545_v11 }
  0xd4   : > { %v518_v12 = vpop.f32.mrf.mxu0 }
  0xd5   : > { %v308_v18 = vadd.f32 %v518_v12, %v488_v14 }
  0xd6   : > { %v299_v13 = vpop.f32.mrf.mxu0 }
  0xd7   : > { %v300_v16 = vadd.f32 %v488_v14, %v299_v13  ;;  %v316_v24 = vmax.f32 %v308_v18, 0.0 }
  0xd8   : > { %v519_v15 = vpop.f32.mrf.mxu0 }
  0xd9   : > { %v311_v17 = vadd.f32 %v519_v15, %v488_v14  ;;  %v314_v22 = vmax.f32 %v300_v16, 0.0 }
  0xda   : > { %v302_v19 = vpop.f32.mrf.mxu0 }
  0xdb   : > { %v303_v20 = vadd.f32 %v488_v14, %v302_v19  ;;  %v317_v21 = vmax.f32 %v311_v17, 0.0 }
  0xdd   : > { %v315_v23 = vmax.f32 %v303_v20, 0.0  ;;  %v319_v26 = vpack.c.bf16 %v317_v21, %v316_v24 }
  0xdf   : > { %v318_v25 = vpack.c.bf16 %v315_v23, %v314_v22 }
  0xe1   : > { %528 = vmatprep.mubr.msk.bf16.mxu1 %vm359_vm1, %v318_v25 }
  0xe2   : > { %529 = vmatmul.mubr.msk.bf16.vlgmr.msra.gmra.mxu1 %vm359_vm1, %v319_v26 }
 0x1a2   : > { %v530_v27 = vpop.f32.mrf.mxu1 }
 0x1a3   : > { %v409_v33 = vadd.f32 %v530_v27, %v493_v28 }
 0x1a4   : > { %v400_v29 = vpop.f32.mrf.mxu1 }
 0x1a5   : > { %v401_v30 = vadd.f32 %v493_v28, %v400_v29  ;;  %v417_v38 = vmax.f32 %v409_v33, 0.0 }
 0x1a6   : > { %v531_v31 = vpop.f32.mrf.mxu1 }
 0x1a7   : > { %v415_v32 = vmax.f32 %v401_v30, 0.0  ;;  %v412_v35 = vadd.f32 %v531_v31, %v493_v28  ;;  %421 = vst.msk [vmem:[%s226_s19 + $0x10] sm:$0xff] %vm258_vm0, %v417_v38 }
 0x1a8   : > { %v403_v34 = vpop.f32.mrf.mxu1 }
 0x1a9   : > { %419 = vst.msk [vmem:[%s226_s19] sm:$0xff] %vm258_vm0, %v415_v32  ;;  %v404_v36 = vadd.f32 %v493_v28, %v403_v34  ;;  %v418_v39 = vmax.f32 %v412_v35, 0.0 }
 0x1ab   : > { %v416_v37 = vmax.f32 %v404_v36, 0.0  ;;  %422 = vst.msk [vmem:[%s226_s19 + $0x18] sm:$0xff] %vm258_vm0, %v418_v39 }
 0x1ad   : > { %420 = vst.msk [vmem:[%s226_s19 + $0x8] sm:$0xff] %vm258_vm0, %v416_v37 }
 0x1ae PF: > { %s15_s18 = sadd.s32 1, %s552_s18  }
 0x1af   : > { %p12_p4 = scmp.ge.s32.totalorder %s15_s18, 4  }
 0x1b1   :  { %14 = sbr.rel (!%p12_p4) target bundleno = 1 (0x1), region = 70 }

// kernel: tpu_custom_call.1
= control target key start
LH: loop header
LB: loop body
LE: loop exit
PB: predicated region body
PF: predicated region fallthrough
CT: control target
= control target key end

     0   :  { %s584_s18 = smov 0   ;;  %s638_s0 = inlined_call_operand.vmem [shape: f32[64,32], index: 0, kind: input, shape index: {}]   ;;  %s639_s1 = inlined_call_operand.vmem [shape: bf16[32,64], index: 1, kind: input, shape index: {}]   ;;  %s640_s2 = inlined_call_operand.vmem [shape: f32[1,64], index: 2, kind: input, shape index: {}]   ;;  %s641_s3 = inlined_call_operand.vmem [shape: bf16[64,32], index: 3, kind: input, shape index: {}]   ;;  %s642_s4 = inlined_call_operand.vmem [shape: f32[1,32], index: 4, kind: input, shape index: {}]   ;;  %s643_s5 = inlined_call_operand.vmem [shape: f32[64,32], index: 5, kind: output, shape index: {}]  }
   0x1 LB: > { %s479_s19 = sadd.s32 4294967295, %s552_s18   ;;  %p483_p0 = scmp.ge.s32.totalorder %s552_s18, 1  ;;  %s552_s18 = sphi %s584_s18, %s15_s18  }
   0x2   : > { %p188_p1 = scmp.lt.s32.totalorder %s552_s18, 3 }
   0x4   : > { %p189_p2 = pnand %p483_p0, %p188_p1 }
   0x5   : > { %s484_s22 = sshll.u32 (!%p189_p2), %s479_s19, 2 }
   0x6   : > { %192 = sbr.rel (%p189_p2) target bundleno = 430 (0x1ae), region = 40  ;;  %p217_p3 = scmp.lt.s32.totalorder (!%p189_p2), %s484_s22, 7 }
   0xb   : > { %v540_v0 = vld [vmem:[%s639_s1 + $0x8] sm:$0xff]   ;;  %v541_v1 = vld [vmem:[%s639_s1] sm:$0xff]   ;;  %v542_v2 = vld [vmem:[%s641_s3 + $0x18] sm:$0xff]   ;;  %s645_s22 = smov (!%p217_p3, %s484_s22), 7  ;;  %vm258_vm0 = vcmask 261120   ;;  %vm359_vm1 = vcmask 523264  }
   0xc   : > { %512 = vmatprep.subr.bf16.mxu0 %v540_v0  ;;  %520 = vmatprep.subr.bf16.mxu1 %v542_v2  ;;  %s485_s27 = sshll.u32 %s645_s22, 3  ;;  %v543_v9 = vld [vmem:[%s641_s3 + $0x10] sm:$0xff]   ;;  %v544_v10 = vld [vmem:[%s641_s3 + $0x8] sm:$0xff]   ;;  %v545_v11 = vld [vmem:[%s641_s3] sm:$0xff]  }
   0xd   : > { %513 = vmatpush3.bf16.msra.mxu0 %v540_v0  ;;  %521 = vmatpush3.bf16.msra.mxu1 %v542_v2  ;;  %s220_s30 = scalar_lea.vmem %s638_s0, %s485_s27  ;;  %v488_v14 = vld [vmem:[%s640_s2] ss:$0 sm:$0xff]  ;;  %s226_s19 = scalar_lea.vmem %s643_s5, %s485_s27 }
   0xe   : > { %514 = vmatprep.subr.bf16.mxu0 %v541_v1  ;;  %v229_v3 = vld [vmem:[%s220_s30] sm:$0xff]  ;;  %v230_v4 = vld [vmem:[%s220_s30 + $0x8] sm:$0xff]  ;;  %v231_v5 = vld [vmem:[%s220_s30 + $0x10] sm:$0xff]  ;;  %522 = vmatprep.subr.bf16.mxu1 %v543_v9 }
   0xf   : > { %v233_v6 = vpack.c.bf16 %v230_v4, %v229_v3  ;;  %v232_v7 = vld [vmem:[%s220_s30 + $0x18] sm:$0xff]  ;;  %v493_v28 = vld [vmem:[%s642_s4] ss:$0 sm:$0xff] }
  0x10   : > { %v234_v8 = vpack.c.bf16 %v232_v7, %v231_v5 }
  0x11   : > { %515 = vmatpush3.bf16.msra.mxu0 %v541_v1  ;;  %516 = vmatprep.mubr.msk.bf16.mxu0 %vm258_vm0, %v233_v6 }
  0x12   : > { %523 = vmatpush3.bf16.msra.mxu1 %v543_v9 }
  0x13   : > { %524 = vmatprep.subr.bf16.mxu1 %v544_v10 }
  0x14   : > { %517 = vmatmul.mubr.msk.bf16.vlgmr.msra.gmra.mxu0 %vm258_vm0, %v234_v8 }
  0x16   : > { %525 = vmatpush3.bf16.msra.mxu1 %v544_v10 }
  0x17   : > { %526 = vmatprep.subr.bf16.mxu1 %v545_v11 }
  0x1a   : > { %527 = vmatpush3.bf16.msra.mxu1 %v545_v11 }
  0xd4   : > { %v518_v12 = vpop.f32.mrf.mxu0 }
  0xd5   : > { %v308_v18 = vadd.f32 %v518_v12, %v488_v14 }
  0xd6   : > { %v299_v13 = vpop.f32.mrf.mxu0 }
  0xd7   : > { %v300_v16 = vadd.f32 %v488_v14, %v299_v13  ;;  %v316_v24 = vmax.f32 %v308_v18, 0.0 }
  0xd8   : > { %v519_v15 = vpop.f32.mrf.mxu0 }
  0xd9   : > { %v311_v17 = vadd.f32 %v519_v15, %v488_v14  ;;  %v314_v22 = vmax.f32 %v300_v16, 0.0 }
  0xda   : > { %v302_v19 = vpop.f32.mrf.mxu0 }
  0xdb   : > { %v303_v20 = vadd.f32 %v488_v14, %v302_v19  ;;  %v317_v21 = vmax.f32 %v311_v17, 0.0 }
  0xdd   : > { %v315_v23 = vmax.f32 %v303_v20, 0.0  ;;  %v319_v26 = vpack.c.bf16 %v317_v21, %v316_v24 }
  0xdf   : > { %v318_v25 = vpack.c.bf16 %v315_v23, %v314_v22 }
  0xe1   : > { %528 = vmatprep.mubr.msk.bf16.mxu1 %vm359_vm1, %v318_v25 }
  0xe2   : > { %529 = vmatmul.mubr.msk.bf16.vlgmr.msra.gmra.mxu1 %vm359_vm1, %v319_v26 }
 0x1a2   : > { %v530_v27 = vpop.f32.mrf.mxu1 }
 0x1a3   : > { %v409_v33 = vadd.f32 %v530_v27, %v493_v28 }
 0x1a4   : > { %v400_v29 = vpop.f32.mrf.mxu1 }
 0x1a5   : > { %v401_v30 = vadd.f32 %v493_v28, %v400_v29  ;;  %v417_v38 = vmax.f32 %v409_v33, 0.0 }
 0x1a6   : > { %v531_v31 = vpop.f32.mrf.mxu1 }
 0x1a7   : > { %v415_v32 = vmax.f32 %v401_v30, 0.0  ;;  %v412_v35 = vadd.f32 %v531_v31, %v493_v28  ;;  %421 = vst.msk [vmem:[%s226_s19 + $0x10] sm:$0xff] %vm258_vm0, %v417_v38 }
 0x1a8   : > { %v403_v34 = vpop.f32.mrf.mxu1 }
 0x1a9   : > { %419 = vst.msk [vmem:[%s226_s19] sm:$0xff] %vm258_vm0, %v415_v32  ;;  %v404_v36 = vadd.f32 %v493_v28, %v403_v34  ;;  %v418_v39 = vmax.f32 %v412_v35, 0.0 }
 0x1ab   : > { %v416_v37 = vmax.f32 %v404_v36, 0.0  ;;  %422 = vst.msk [vmem:[%s226_s19 + $0x18] sm:$0xff] %vm258_vm0, %v418_v39 }
 0x1ad   : > { %420 = vst.msk [vmem:[%s226_s19 + $0x8] sm:$0xff] %vm258_vm0, %v416_v37 }
 0x1ae PF: > { %s15_s18 = sadd.s32 1, %s552_s18  }
 0x1af   : > { %p12_p4 = scmp.ge.s32.totalorder %s15_s18, 4  }
 0x1b1   :  { %14 = sbr.rel (!%p12_p4) target bundleno = 1 (0x1), region = 70 }

</bundles_post_ra>
